<compile_context>
chip_gen: v6e
topology: v6e:2x2x1
jax: 0.10.0
libtpu: 0.0.40
codegen_flags: <defaults>
</compile_context>

<pallas_src>
import functools

import jax
import jax.numpy as jnp
from jax.experimental import pallas as pl
from jax.experimental.pallas import tpu as pltpu


# ---------------------------------------------------------------------------
# Kernels
# ---------------------------------------------------------------------------

def _folded_kernel(C, pad, Hs, precision, x_ref, sel_ref, o_ref):
    """Lane-folded path.

    x_ref  : (Nb, C*Hs, L)    folded input, L = k*W on the lane axis
    sel_ref: (L, Lo)          0/1 selection (H & W stride-2 subsample)
    o_ref  : (Nb, Co*Hs, Lo)  folded output, Co = C + 2*pad, Lo = (k//2)*Wo
    """
    Nb, rows, L = x_ref.shape
    Lo = o_ref.shape[2]

    # Tile-aligned (no-op) reshape -> one dense 2-D MXU matmul that performs
    # both the H and the W subsample.  sel is one-hot so accumulating in the
    # output dtype is exact (no separate f32 temporary / cast pass).
    sub = jnp.dot(
        x_ref[...].reshape(Nb * rows, L),
        sel_ref[...],
        preferred_element_type=o_ref.dtype,
        precision=precision,
    ).reshape(Nb, rows, Lo)

    # Zero only the pad channel slabs; write the data slab exactly once.
    if pad > 0:
        z = jnp.zeros((Nb, pad * Hs, Lo), o_ref.dtype)
        o_ref[:, : pad * Hs, :] = z
        o_ref[:, (pad + C) * Hs:, :] = z
    o_ref[:, pad * Hs:(pad + C) * Hs, :] = sub


def _rows_kernel(pad, precision, x_ref, sel_ref, o_ref):
    """Row-skip / pre-sliced path (odd H rows already removed, either by the
    BlockSpec squeeze in "skip" mode or by the wrapper in "presliced" mode).

    x_ref  : (Nb, C, Ho, W)
    sel_ref: (W, Wo)          0/1 selection (W stride-2 subsample only)
    o_ref  : (Nb, Co, Ho, Wo)
    """
    Nb, C, Ho, W = x_ref.shape
    Wo = o_ref.shape[3]

    sub = jnp.dot(
        x_ref[...].reshape(Nb * C * Ho, W),
        sel_ref[...],
        preferred_element_type=o_ref.dtype,
        precision=precision,
    ).reshape(Nb, C, Ho, Wo)

    if pad > 0:
        z = jnp.zeros((Nb, pad, Ho, Wo), o_ref.dtype)
        o_ref[:, :pad, :, :] = z
        o_ref[:, pad + C:, :, :] = z
    o_ref[:, pad:pad + C, :, :] = sub


# ---------------------------------------------------------------------------
# Heuristics
# ---------------------------------------------------------------------------

def _choose_fold(C, H, W, pad):
    """Largest power-of-two k with: k | H, L = k*W <= 512, and tile-aligned
    channel slabs (8 | C*(H//k) and 8 | pad*(H//k)).  Growth stops once the
    OUTPUT lane width Lo = (k//2)*ceil(W/2) fills a vreg (128 lanes)."""
    Wo = (W + 1) // 2
    best, cand = 1, 2
    while H % cand == 0 and cand * W <= 512:
        Hs = H // cand
        if (C * Hs) % 8 == 0 and (pad * Hs) % 8 == 0:
            best = cand
            if (cand // 2) * Wo >= 128:
                break
        cand *= 2
    return best


def _vmem_limit_bytes():
    """Per-generation scoped-VMEM budget (v5e/v6e: 128 MiB phys, v7x: 64 MiB).
    Falls back to a conservative value if the query is unavailable."""
    cap = 64 * 1024 * 1024
    try:
        cap = int(pltpu.get_tpu_info().vmem_capacity_bytes)
    except Exception:
        pass
    return int(min(cap * 3 // 4, 96 * 1024 * 1024))


def _choose_batch_block(N, per_image_bytes, fixed_bytes, budget_bytes,
                        min_steps=4):
    """Images per grid step: fill the VMEM budget (counting 2x double-buffered
    input + 2x output + matmul temp), but keep >= min(N, min_steps) grid steps
    so the DMA pipeline has work to overlap and v7x megacore can use both
    TensorCores."""
    avail = max(budget_bytes - fixed_bytes, per_image_bytes)
    nb = max(1, min(N, avail // max(per_image_bytes, 1)))
    want = min(N, min_steps)
    if want > 1:
        nb = min(nb, max(1, N // want))
    return int(nb)


# ---------------------------------------------------------------------------
# Wrapper
# ---------------------------------------------------------------------------

def lambda_layer(x, planes, *, batch_block=None):
    """Pallas equivalent of LambdaLayer with the ResNet option-A shortcut lambda.

    x: (N, C, H, W) floating point.
    Returns (N, C + 2*(planes//4), ceil(H/2), ceil(W/2)).
    """
    N, C, H, W = x.shape
    Ho, Wo = (H + 1) // 2, (W + 1) // 2
    pad = planes // 4
    Co = C + 2 * pad
    dt = x.dtype
    itemsize = jnp.dtype(dt).itemsize

    if not jnp.issubdtype(dt, jnp.floating):
        # TODO(synk): integer / fp8 activations need a non-matmul (pure DMA /
        # slice) path; v7x's MXU has no integer datapath.
        raise NotImplementedError("lambda_layer: only floating dtypes supported")

    k = _choose_fold(C, H, W, pad)
    if H % 2 == 0 and (W * itemsize >= 512 or k < 2):
        mode = "skip"          # odd H rows never leave HBM (strided window DMA)
    elif k >= 2:
        mode = "fold"          # lane-fold + single selection matmul
    else:
        mode = "presliced"     # odd H (never hit by ResNet): H subsample in XLA

    vmem_limit = _vmem_limit_bytes()
    block_budget = vmem_limit * 3 // 4

    if mode == "fold":
        Hs = H // k
        L, Lo = k * W, (k // 2) * Wo
        x_in = x.reshape(N, C * Hs, L)                      # free (contiguous)
        per_image = itemsize * (2 * C * Hs * L + 2 * Co * Hs * Lo + C * Hs * Lo)
        fixed = 2 * itemsize * L * Lo + (2 << 20)
        Nb = batch_block or _choose_batch_block(N, per_image, fixed, block_budget)
        Nb = max(1, min(int(Nb), N))
        in_specs = [pl.BlockSpec((Nb, C * Hs, L), lambda n: (n, 0, 0)),
                    pl.BlockSpec((L, Lo), lambda n: (0, 0))]
        out_spec = pl.BlockSpec((Nb, Co * Hs, Lo), lambda n: (n, 0, 0))
        out_shape = jax.ShapeDtypeStruct((N, Co * Hs, Lo), dt)
        build_kernel = lambda prec: functools.partial(_folded_kernel, C, pad, Hs, prec)
        # One 0/1 matrix selects even H rows inside each folded group of k rows
        # AND even W columns.
        r = jnp.arange(L)
        c = jnp.arange(Lo)
        sel = ((r[:, None] // W == 2 * (c[None, :] // Wo)) &
               (r[:, None] % W == 2 * (c[None, :] % Wo))).astype(dt)
        in_elems, out_elems, rows = C * Hs * L, Co * Hs * Lo, C * Hs
    else:
        L, Lo = W, Wo
        per_image = itemsize * (2 * C * Ho * W + 2 * Co * Ho * Wo + C * Ho * Wo)
        fixed = 2 * itemsize * L * Lo + (2 << 20)
        Nb = batch_block or _choose_batch_block(N, per_image, fixed, block_budget)
        Nb = max(1, min(int(Nb), N))
        if mode == "skip":
            # Squeezed size-1 block on the row-parity axis: only even H rows
            # are ever DMA'd from HBM (contiguous chunks of W*itemsize bytes).
            x_in = x.reshape(N, C, Ho, 2, W)                # free (contiguous)
            in0 = pl.BlockSpec((Nb, C, Ho, None, W), lambda n: (n, 0, 0, 0, 0))
        else:
            # TODO(synk): odd H has no stride-2-friendly reshape; subsample H
            # in XLA here (rare; never occurs in the ResNet shortcut shapes).
            x_in = x[:, :, ::2, :]
            in0 = pl.BlockSpec((Nb, C, Ho, W), lambda n: (n, 0, 0, 0))
        in_specs = [in0, pl.BlockSpec((L, Lo), lambda n: (0, 0))]
        out_spec = pl.BlockSpec((Nb, Co, Ho, Wo), lambda n: (n, 0, 0, 0))
        out_shape = jax.ShapeDtypeStruct((N, Co, Ho, Wo), dt)
        build_kernel = lambda prec: functools.partial(_rows_kernel, pad, prec)
        r = jnp.arange(W)
        c = jnp.arange(Wo)
        sel = (r[:, None] == 2 * c[None, :]).astype(dt)
        in_elems, out_elems, rows = C * Ho * W, Co * Ho * Wo, C * Ho

    grid = (pl.cdiv(N, Nb),)
    cost = pl.CostEstimate(
        flops=2 * N * rows * L * Lo,
        transcendentals=0,
        bytes_accessed=itemsize * (N * in_elems + N * out_elems + L * Lo),
    )

    def _run(precision):
        return pl.pallas_call(
            build_kernel(precision),
            out_shape=out_shape,
            grid=grid,
            in_specs=in_specs,
            out_specs=out_spec,
            compiler_params=pltpu.CompilerParams(
                dimension_semantics=("parallel",),
                vmem_limit_bytes=vmem_limit,
            ),
            cost_estimate=cost,
        )(x_in, sel)

    if dt == jnp.float32:
        # Pure relayout/pad must be bit-exact: request a full-precision MXU
        # contraction for f32 operands.  If this Mosaic build rejects the
        # explicit precision, fall back (exactness is asserted vs. the
        # reference in the tests below).
        try:
            out = _run(jax.lax.Precision.HIGHEST)
        except Exception:
            out = _run(jax.lax.Precision.DEFAULT)
    else:
        out = _run(jax.lax.Precision.DEFAULT)

    return out.reshape(N, Co, Ho, Wo)


# ---------------------------------------------------------------------------
# Reference + tests
# ---------------------------------------------------------------------------

def _reference(x, planes):
    # Pure-JAX reference of the PyTorch lambda:
    # F.pad(x[:, :, ::2, ::2], (0,0,0,0,planes//4,planes//4), "constant", 0)
    pad = planes // 4
    return jnp.pad(x[:, :, ::2, ::2], ((0, 0), (pad, pad), (0, 0), (0, 0)))


def _check(name, x, planes, **kw):
    out = jax.block_until_ready(lambda_layer(x, planes, **kw))
    ref = _reference(x, planes)
    assert out.shape == ref.shape, (name, out.shape, ref.shape)
    assert out.dtype == ref.dtype, (name, out.dtype, ref.dtype)
    assert jnp.allclose(out.astype(jnp.float32), ref.astype(jnp.float32),
                        atol=1e-6), f"mismatch vs reference in {name}"


if __name__ == "__main__":
    key = jax.random.PRNGKey(0)
    k1, k2, k3, k4 = jax.random.split(key, 4)

    # Primary small-shape case (typical ResNet option-A shortcut): folded path.
    x = jax.random.normal(k1, (2, 4, 16, 16), dtype=jnp.float32)
    _check("fold_f32", x, planes=8)

    # bf16: selection matmul accumulates directly in bf16 (one-hot => exact).
    _check("fold_bf16", x.astype(jnp.bfloat16), planes=8)

    # Wide rows: odd H rows are skipped at the DMA level (squeezed parity axis).
    x2 = jax.random.normal(k2, (2, 3, 8, 128), dtype=jnp.float32)
    _check("skip_f32", x2, planes=8)

    # Batch not divisible by the batch block (last grid step partially OOB).
    x3 = jax.random.normal(k3, (3, 8, 16, 16), dtype=jnp.float32)
    _check("ragged_batch", x3, planes=16, batch_block=2)

    # Odd H fallback (H subsample in the wrapper, W subsample in the kernel).
    x4 = jax.random.normal(k4, (1, 4, 7, 16), dtype=jnp.float32)
    _check("odd_h", x4, planes=8)

    print("KERNEL_OK")
</pallas_src>

<mosaic_0001>
module attributes {stable_mosaic.version = 11 : i64} {
  func.func @_folded_kernel(%arg0: i32, %arg1: memref<1x16x64xf32, #tpu.memory_space<vmem>>, %arg2: memref<64x16xf32, #tpu.memory_space<vmem>>, %arg3: memref<1x32x16xf32, #tpu.memory_space<vmem>>) attributes {dimension_semantics = [#tpu.dimension_semantics<parallel>], iteration_bounds = array<i64: 2>, scalar_prefetch = 0 : i64, scratch_operands = 0 : i64, tpu.core_type = #tpu.core_type<tc>, window_params = [{transform_indices = @transform_0, window_bounds = array<i64: 1, 16, 64>}, {pipeline_mode = #tpu.pipeline_mode<synchronous>, transform_indices = @transform_1, window_bounds = array<i64: 64, 16>}, {transform_indices = @transform_2, window_bounds = array<i64: 1, 32, 16>}]} {
    %c0 = arith.constant 0 : index
    %c0_0 = arith.constant 0 : index
    %c0_1 = arith.constant 0 : index
    %0 = vector.load %arg1[%c0, %c0_0, %c0_1] : memref<1x16x64xf32, #tpu.memory_space<vmem>>, vector<1x16x64xf32>
    %1 = vector.shape_cast %0 : vector<1x16x64xf32> to vector<16x64xf32>
    %c0_2 = arith.constant 0 : index
    %c0_3 = arith.constant 0 : index
    %2 = vector.load %arg2[%c0_2, %c0_3] : memref<64x16xf32, #tpu.memory_space<vmem>>, vector<64x16xf32>
    %cst = arith.constant dense<0.000000e+00> : vector<16x16xf32>
    %3 = tpu.matmul %1, %2, %cst {dimension_numbers = #tpu.dot_dimension_numbers<[1], [0], [0], [1], [0, 0, 1, 1], [], []>, precision = #tpu.contract_precision<fp32>} : vector<16x64xf32>, vector<64x16xf32>, vector<16x16xf32> -> vector<16x16xf32>
    %4 = vector.shape_cast %3 : vector<16x16xf32> to vector<1x16x16xf32>
    %cst_4 = arith.constant 0.000000e+00 : f32
    %5 = vector.broadcast %cst_4 : f32 to vector<1x8x16xf32>
    %c0_5 = arith.constant 0 : index
    %c0_6 = arith.constant 0 : index
    %c0_7 = arith.constant 0 : index
    %6 = vector.load %arg3[%c0_5, %c0_6, %c0_7] : memref<1x32x16xf32, #tpu.memory_space<vmem>>, vector<1x8x16xf32>
    tpu.vector_store %arg3[%c0_5, %c0_6, %c0_7], %5 {strides = array<i32>} : memref<1x32x16xf32, #tpu.memory_space<vmem>>, vector<1x8x16xf32>,
    %c0_8 = arith.constant 0 : index
    %c24 = arith.constant 24 : index
    %c0_9 = arith.constant 0 : index
    %7 = vector.load %arg3[%c0_8, %c24, %c0_9] : memref<1x32x16xf32, #tpu.memory_space<vmem>>, vector<1x8x16xf32>
    tpu.vector_store %arg3[%c0_8, %c24, %c0_9], %5 {strides = array<i32>} : memref<1x32x16xf32, #tpu.memory_space<vmem>>, vector<1x8x16xf32>,
    %c0_10 = arith.constant 0 : index
    %c8 = arith.constant 8 : index
    %c0_11 = arith.constant 0 : index
    %8 = vector.load %arg3[%c0_10, %c8, %c0_11] : memref<1x32x16xf32, #tpu.memory_space<vmem>>, vector<1x16x16xf32>
    tpu.vector_store %arg3[%c0_10, %c8, %c0_11], %4 {strides = array<i32>} : memref<1x32x16xf32, #tpu.memory_space<vmem>>, vector<1x16x16xf32>,
    return
  }
  func.func @transform_0(%arg0: i32) -> (i32, i32, i32) {
    %c0_i32 = arith.constant 0 : i32
    %c0_i32_0 = arith.constant 0 : i32
    %c0_i32_1 = arith.constant 0 : i32
    return %arg0, %c0_i32, %c0_i32_0 : i32, i32, i32
  }
  func.func @transform_1(%arg0: i32) -> (i32, i32) {
    %c0_i32 = arith.constant 0 : i32
    %c0_i32_0 = arith.constant 0 : i32
    %c0_i32_1 = arith.constant 0 : i32
    return %c0_i32, %c0_i32_0 : i32, i32
  }
  func.func @transform_2(%arg0: i32) -> (i32, i32, i32) {
    %c0_i32 = arith.constant 0 : i32
    %c0_i32_0 = arith.constant 0 : i32
    %c0_i32_1 = arith.constant 0 : i32
    return %arg0, %c0_i32, %c0_i32_0 : i32, i32, i32
  }
}

module attributes {stable_mosaic.version = 11 : i64} {
  func.func @_folded_kernel(%arg0: i32, %arg1: memref<1x16x64xf32, #tpu.memory_space<vmem>>, %arg2: memref<64x16xf32, #tpu.memory_space<vmem>>, %arg3: memref<1x32x16xf32, #tpu.memory_space<vmem>>) attributes {dimension_semantics = [#tpu.dimension_semantics<parallel>], iteration_bounds = array<i64: 2>, scalar_prefetch = 0 : i64, scratch_operands = 0 : i64, tpu.core_type = #tpu.core_type<tc>, window_params = [{transform_indices = @transform_0, window_bounds = array<i64: 1, 16, 64>}, {pipeline_mode = #tpu.pipeline_mode<synchronous>, transform_indices = @transform_1, window_bounds = array<i64: 64, 16>}, {transform_indices = @transform_2, window_bounds = array<i64: 1, 32, 16>}]} {
    %c0 = arith.constant 0 : index
    %c0_0 = arith.constant 0 : index
    %c0_1 = arith.constant 0 : index
    %0 = vector.load %arg1[%c0, %c0_0, %c0_1] : memref<1x16x64xf32, #tpu.memory_space<vmem>>, vector<1x16x64xf32>
    %1 = vector.shape_cast %0 : vector<1x16x64xf32> to vector<16x64xf32>
    %c0_2 = arith.constant 0 : index
    %c0_3 = arith.constant 0 : index
    %2 = vector.load %arg2[%c0_2, %c0_3] : memref<64x16xf32, #tpu.memory_space<vmem>>, vector<64x16xf32>
    %cst = arith.constant dense<0.000000e+00> : vector<16x16xf32>
    %3 = tpu.matmul %1, %2, %cst {dimension_numbers = #tpu.dot_dimension_numbers<[1], [0], [0], [1], [0, 0, 1, 1], [], []>} : vector<16x64xf32>, vector<64x16xf32>, vector<16x16xf32> -> vector<16x16xf32>
    %4 = vector.shape_cast %3 : vector<16x16xf32> to vector<1x16x16xf32>
    %cst_4 = arith.constant 0.000000e+00 : f32
    %5 = vector.broadcast %cst_4 : f32 to vector<1x8x16xf32>
    %c0_5 = arith.constant 0 : index
    %c0_6 = arith.constant 0 : index
    %c0_7 = arith.constant 0 : index
    %6 = vector.load %arg3[%c0_5, %c0_6, %c0_7] : memref<1x32x16xf32, #tpu.memory_space<vmem>>, vector<1x8x16xf32>
    tpu.vector_store %arg3[%c0_5, %c0_6, %c0_7], %5 {strides = array<i32>} : memref<1x32x16xf32, #tpu.memory_space<vmem>>, vector<1x8x16xf32>,
    %c0_8 = arith.constant 0 : index
    %c24 = arith.constant 24 : index
    %c0_9 = arith.constant 0 : index
    %7 = vector.load %arg3[%c0_8, %c24, %c0_9] : memref<1x32x16xf32, #tpu.memory_space<vmem>>, vector<1x8x16xf32>
    tpu.vector_store %arg3[%c0_8, %c24, %c0_9], %5 {strides = array<i32>} : memref<1x32x16xf32, #tpu.memory_space<vmem>>, vector<1x8x16xf32>,
    %c0_10 = arith.constant 0 : index
    %c8 = arith.constant 8 : index
    %c0_11 = arith.constant 0 : index
    %8 = vector.load %arg3[%c0_10, %c8, %c0_11] : memref<1x32x16xf32, #tpu.memory_space<vmem>>, vector<1x16x16xf32>
    tpu.vector_store %arg3[%c0_10, %c8, %c0_11], %4 {strides = array<i32>} : memref<1x32x16xf32, #tpu.memory_space<vmem>>, vector<1x16x16xf32>,
    return
  }
  func.func @transform_0(%arg0: i32) -> (i32, i32, i32) {
    %c0_i32 = arith.constant 0 : i32
    %c0_i32_0 = arith.constant 0 : i32
    %c0_i32_1 = arith.constant 0 : i32
    return %arg0, %c0_i32, %c0_i32_0 : i32, i32, i32
  }
  func.func @transform_1(%arg0: i32) -> (i32, i32) {
    %c0_i32 = arith.constant 0 : i32
    %c0_i32_0 = arith.constant 0 : i32
    %c0_i32_1 = arith.constant 0 : i32
    return %c0_i32, %c0_i32_0 : i32, i32
  }
  func.func @transform_2(%arg0: i32) -> (i32, i32, i32) {
    %c0_i32 = arith.constant 0 : i32
    %c0_i32_0 = arith.constant 0 : i32
    %c0_i32_1 = arith.constant 0 : i32
    return %arg0, %c0_i32, %c0_i32_0 : i32, i32, i32
  }
}

</mosaic_0001>

<bundles_post_ra>
// kernel: tpu_custom_call.1
= control target key start
LH: loop header
LB: loop body
LE: loop exit
PB: predicated region body
PF: predicated region fallthrough
CT: control target
= control target key end

     0   :  { %s1021_s9 = smov 0   ;;  %s1262_s0 = inlined_call_operand.vmem [shape: f32[2,16,64], index: 0, kind: input, shape index: {}]   ;;  %s1263_s1 = inlined_call_operand.vmem [shape: f32[64,16], index: 1, kind: input, shape index: {}]   ;;  %s1264_s2 = inlined_call_operand.vmem [shape: f32[2,32,16], index: 2, kind: output, shape index: {}]  }
   0x1 LB: > { %s801_s10 = sadd.s32 4294967295, %s1003_s9   ;;  %p805_p0 = scmp.ge.s32.totalorder %s1003_s9, 1  ;;  %s1003_s9 = sphi %s1021_s9, %s12_s9  }
   0x2   : > { %p112_p1 = scmp.lt.s32.totalorder %s1003_s9, 3 }
   0x4   : > { %p113_p2 = pnand %p805_p0, %p112_p1 }
   0x5   : > { %p134_p3 = scmp.lt.s32.totalorder (!%p113_p2), %s801_s10, 1 }
   0x6   : > { %116 = sbr.rel (%p113_p2) target bundleno = 272 (0x110), region = 28 }
   0xb   : > { %v153_v0 = vld [vmem:[%s1263_s1 + $0x38] sm:$0xff]  ;;  %v152_v1 = vld [vmem:[%s1263_s1 + $0x30] sm:$0xff]  ;;  %v151_v2 = vld [vmem:[%s1263_s1 + $0x28] sm:$0xff]  ;;  %s1266_s10 = smov (!%p134_p3, %s801_s10), 1  ;;  %vm154_vm0 = vcmask 523264   ;;  %vm741_vm1 = vcmask 130048  }
   0xc   : > { %v1038_v3 = vand.u32 4294901760, %v153_v0  ;;  %v1040_v4 = vand.u32 4294901760, %v152_v1  ;;  %v1042_v5 = vand.u32 4294901760, %v151_v2  ;;  %v150_v6 = vld [vmem:[%s1263_s1 + $0x20] sm:$0xff]  ;;  %v149_v7 = vld [vmem:[%s1263_s1 + $0x18] sm:$0xff]  ;;  %v148_v8 = vld [vmem:[%s1263_s1 + $0x10] sm:$0xff] }
   0xd   : > { %v1053_v9 = vand.u32 4294901760, %v150_v6  ;;  %v1055_v10 = vand.u32 4294901760, %v149_v7  ;;  %v1057_v11 = vand.u32 4294901760, %v148_v8  ;;  %v147_v12 = vld [vmem:[%s1263_s1 + $0x8] sm:$0xff]  ;;  %v146_v16 = vld [vmem:[%s1263_s1] sm:$0xff]  ;;  %s812_s27 = sshll.u32 %s1266_s10, 4 }
   0xe   : > { %874 = vmatprep.subr.mxu0 %v1038_v3  ;;  %v1066_v13 = vsub.f32 %v153_v0, %v1038_v3  ;;  %v1069_v14 = vsub.f32 %v152_v1, %v1040_v4  ;;  %v1072_v15 = vsub.f32 %v151_v2, %v1042_v5  ;;  %v1078_v17 = vand.u32 4294901760, %v147_v12  ;;  %s138_s30 = scalar_lea.vmem %s1262_s0, %s812_s27  ;;  %s813_s3 = sshll.u32 %s1266_s10, 5 }
   0xf   : > { %875 = vmatpush3.msra.mxu0 %v1038_v3  ;;  %v1081_v18 = vsub.f32 %v150_v6, %v1053_v9  ;;  %v1085_v19 = vsub.f32 %v149_v7, %v1055_v10  ;;  %v1101_v23 = vand.u32 4294901760, %v146_v16  ;;  %v144_v25 = vld [vmem:[%s138_s30] sm:$0xff]  ;;  %v145_v26 = vld [vmem:[%s138_s30 + $0x8] sm:$0xff]  ;;  %v1110_v28 = vsub.f32 %v148_v8, %v1057_v11  ;;  %s143_s6 = scalar_lea.vmem %s1264_s2, %s813_s3 }
  0x10   : > { %876 = vmatprep.subr.mxu0 %v1040_v4  ;;  %v1089_v20 = vand.u32 4294901760, %v1066_v13  ;;  %v1092_v21 = vand.u32 4294901760, %v1069_v14  ;;  %v1095_v22 = vand.u32 4294901760, %v1072_v15  ;;  %v156_v32 = vsel %vm154_vm0, %v144_v25, 0 }
  0x11   : > { %877 = vmatpush3.msra.mxu0 %v1040_v4  ;;  %v1104_v24 = vand.u32 4294901760, %v1081_v18  ;;  %v1107_v27 = vand.u32 4294901760, %v1085_v19  ;;  %v159_v33 = vsel %vm154_vm0, %v145_v26, 0  ;;  %v1122_v34 = vand.u32 4294901760, %v156_v32 }
  0x12   : > { %878 = vmatprep.subr.mxu0 %v1042_v5  ;;  %v274_v29 = vsub.f32 %v1066_v13, %v1089_v20  ;;  %v281_v30 = vsub.f32 %v1069_v14, %v1092_v21  ;;  %v288_v31 = vsub.f32 %v1072_v15, %v1095_v22  ;;  %v1125_v35 = vsub.f32 %v147_v12, %v1078_v17 }
  0x13   : > { %879 = vmatpush3.msra.mxu0 %v1042_v5  ;;  %v295_v38 = vsub.f32 %v1081_v18, %v1104_v24  ;;  %v1130_v39 = vand.u32 4294901760, %v159_v33  ;;  %v1134_v40 = vsub.f32 %v156_v32, %v1122_v34  ;;  %v1137_v41 = vand.u32 4294901760, %v1110_v28  ;;  %909 = vmatprep.mubr.f32.mxu1 %v1122_v34 }
  0x14   : > { %880 = vmatprep.subr.mxu0 %v1053_v9  ;;  %v275_v36 = vand.u32 4294901760, %v274_v29  ;;  %v282_v37 = vand.u32 4294901760, %v281_v30  ;;  %v1140_v42 = vsub.f32 %v146_v16, %v1101_v23  ;;  %v289_v43 = vand.u32 4294901760, %v288_v31 }
  0x15   : > { %881 = vmatpush3.msra.mxu0 %v1053_v9  ;;  %v302_v44 = vsub.f32 %v1085_v19, %v1107_v27  ;;  %v1147_v45 = vsub.f32 %v159_v33, %v1130_v39  ;;  %v236_v46 = vand.u32 4294901760, %v1134_v40  ;;  %v1152_v47 = vand.u32 4294901760, %v1125_v35 }
  0x16   : > { %882 = vmatprep.subr.mxu0 %v1055_v10  ;;  %893 = vmatprep.subr.mxu1 %v275_v36  ;;  %v296_v48 = vand.u32 4294901760, %v295_v38  ;;  %v309_v51 = vsub.f32 %v1110_v28, %v1137_v41  ;;  %v1163_v52 = vand.u32 4294901760, %v1140_v42  ;;  %v1005_v62 = vmov 0.0  }
  0x17   : > { %883 = vmatpush3.msra.mxu0 %v1055_v10  ;;  %894 = vmatpush3.msra.mxu1 %v275_v36  ;;  %v246_v49 = vand.u32 4294901760, %v1147_v45  ;;  %v237_v50 = vsub.f32 %v1134_v40, %v236_v46  ;;  %v303_v53 = vand.u32 4294901760, %v302_v44  ;;  %v316_v56 = vsub.f32 %v1125_v35, %v1152_v47  ;;  %742 = vst.msk [vmem:[%s143_s6] sm:$0xff] %vm741_vm1, %v1005_v62 }
  0x18   : > { %884 = vmatprep.subr.mxu0 %v1057_v11  ;;  %895 = vmatprep.subr.mxu1 %v282_v37  ;;  %v310_v58 = vand.u32 4294901760, %v309_v51  ;;  %v323_v59 = vsub.f32 %v1140_v42, %v1163_v52  ;;  %743 = vst.msk [vmem:[%s143_s6 + $0x18] sm:$0xff] %vm741_vm1, %v1005_v62 }
  0x19   : > { %885 = vmatpush3.msra.mxu0 %v1057_v11  ;;  %896 = vmatpush3.msra.mxu1 %v282_v37  ;;  %v247_v54 = vsub.f32 %v1147_v45, %v246_v49  ;;  %v238_v55 = vand.u32 4294901760, %v237_v50  ;;  %v317_v60 = vand.u32 4294901760, %v316_v56 }
  0x1a   : > { %886 = vmatprep.subr.mxu0 %v1078_v17  ;;  %897 = vmatprep.subr.mxu1 %v289_v43  ;;  %v324_v61 = vand.u32 4294901760, %v323_v59 }
  0x1b   : > { %887 = vmatpush3.msra.mxu0 %v1078_v17  ;;  %898 = vmatpush3.msra.mxu1 %v289_v43  ;;  %v248_v57 = vand.u32 4294901760, %v247_v54 }
  0x1c   : > { %888 = vmatprep.subr.mxu0 %v1101_v23  ;;  %899 = vmatprep.subr.mxu1 %v296_v48 }
  0x1d   : > { %889 = vmatpush3.msra.mxu0 %v1101_v23  ;;  %900 = vmatpush3.msra.mxu1 %v296_v48 }
  0x1e   : > { %890 = vmatprep.mubr.f32.mxu0 %v238_v55  ;;  %901 = vmatprep.subr.mxu1 %v303_v53 }
  0x1f   : > { %912 = vmatprep.subr.mxu0 %v1066_v13  ;;  %891 = vmatmul.mubr.f32.vlgmr.msra.gmra.mxu0 %v248_v57 }
  0x20   : > { %902 = vmatpush3.msra.mxu1 %v303_v53  ;;  %913 = vmatpush3.msra.mxu0 %v1066_v13 }
  0x21   : > { %903 = vmatprep.subr.mxu1 %v310_v58  ;;  %914 = vmatprep.subr.mxu0 %v1069_v14 }
  0x22   : > { %904 = vmatpush3.msra.mxu1 %v310_v58  ;;  %915 = vmatpush3.msra.mxu0 %v1069_v14 }
  0x23   : > { %905 = vmatprep.subr.mxu1 %v317_v60  ;;  %916 = vmatprep.subr.mxu0 %v1072_v15 }
  0x24   : > { %906 = vmatpush3.msra.mxu1 %v317_v60  ;;  %917 = vmatpush3.msra.mxu0 %v1072_v15 }
  0x25   : > { %907 = vmatprep.subr.mxu1 %v324_v61  ;;  %918 = vmatprep.subr.mxu0 %v1081_v18 }
  0x26   : > { %908 = vmatpush3.msra.mxu1 %v324_v61  ;;  %919 = vmatpush3.msra.mxu0 %v1081_v18 }
  0x27   : > { %910 = vmatmul.mubr.f32.vlgmr.msra.gmra.mxu1 %v1130_v39  ;;  %920 = vmatprep.subr.mxu0 %v1085_v19 }
  0x28   : > { %931 = vmatprep.subr.mxu1 %v1038_v3  ;;  %921 = vmatpush3.msra.mxu0 %v1085_v19 }
  0x29   : > { %932 = vmatpush3.msra.mxu1 %v1038_v3  ;;  %922 = vmatprep.subr.mxu0 %v1110_v28 }
  0x2a   : > { %933 = vmatprep.subr.mxu1 %v1040_v4  ;;  %923 = vmatpush3.msra.mxu0 %v1110_v28 }
  0x2b   : > { %934 = vmatpush3.msra.mxu1 %v1040_v4  ;;  %924 = vmatprep.subr.mxu0 %v1125_v35 }
  0x2c   : > { %935 = vmatprep.subr.mxu1 %v1042_v5  ;;  %925 = vmatpush3.msra.mxu0 %v1125_v35 }
  0x2d   : > { %936 = vmatpush3.msra.mxu1 %v1042_v5  ;;  %926 = vmatprep.subr.mxu0 %v1140_v42 }
  0x2e   : > { %937 = vmatprep.subr.mxu1 %v1053_v9  ;;  %927 = vmatpush3.msra.mxu0 %v1140_v42 }
  0x2f   : > { %928 = vmatprep.mubr.f32.mxu0 %v1134_v40  ;;  %938 = vmatpush3.msra.mxu1 %v1053_v9 }
  0x30   : > { %929 = vmatmul.mubr.f32.vlgmr.msra.gmra.mxu0 %v1147_v45  ;;  %939 = vmatprep.subr.mxu1 %v1055_v10 }
  0x31   : > { %950 = vmatprep.subr.mxu0 %v1089_v20  ;;  %940 = vmatpush3.msra.mxu1 %v1055_v10 }
  0x32   : > { %951 = vmatpush3.msra.mxu0 %v1089_v20  ;;  %941 = vmatprep.subr.mxu1 %v1057_v11 }
  0x33   : > { %952 = vmatprep.subr.mxu0 %v1092_v21  ;;  %942 = vmatpush3.msra.mxu1 %v1057_v11 }
  0x34   : > { %953 = vmatpush3.msra.mxu0 %v1092_v21  ;;  %943 = vmatprep.subr.mxu1 %v1078_v17 }
  0x35   : > { %954 = vmatprep.subr.mxu0 %v1095_v22  ;;  %944 = vmatpush3.msra.mxu1 %v1078_v17 }
  0x36   : > { %955 = vmatpush3.msra.mxu0 %v1095_v22  ;;  %945 = vmatprep.subr.mxu1 %v1101_v23 }
  0x37   : > { %956 = vmatprep.subr.mxu0 %v1104_v24  ;;  %946 = vmatpush3.msra.mxu1 %v1101_v23 }
  0x38   : > { %947 = vmatprep.mubr.f32.mxu1 %v236_v46  ;;  %957 = vmatpush3.msra.mxu0 %v1104_v24 }
  0x39   : > { %948 = vmatmul.mubr.f32.vlgmr.msra.gmra.mxu1 %v246_v49  ;;  %958 = vmatprep.subr.mxu0 %v1107_v27 }
  0x3a   : > { %969 = vmatprep.subr.mxu1 %v1038_v3  ;;  %959 = vmatpush3.msra.mxu0 %v1107_v27 }
  0x3b   : > { %970 = vmatpush3.msra.mxu1 %v1038_v3  ;;  %960 = vmatprep.subr.mxu0 %v1137_v41 }
  0x3c   : > { %971 = vmatprep.subr.mxu1 %v1040_v4  ;;  %961 = vmatpush3.msra.mxu0 %v1137_v41 }
  0x3d   : > { %972 = vmatpush3.msra.mxu1 %v1040_v4  ;;  %962 = vmatprep.subr.mxu0 %v1152_v47 }
  0x3e   : > { %973 = vmatprep.subr.mxu1 %v1042_v5  ;;  %963 = vmatpush3.msra.mxu0 %v1152_v47 }
  0x3f   : > { %974 = vmatpush3.msra.mxu1 %v1042_v5  ;;  %964 = vmatprep.subr.mxu0 %v1163_v52 }
  0x40   : > { %975 = vmatprep.subr.mxu1 %v1053_v9  ;;  %965 = vmatpush3.msra.mxu0 %v1163_v52 }
  0x41   : > { %966 = vmatprep.mubr.f32.mxu0 %v1122_v34  ;;  %976 = vmatpush3.msra.mxu1 %v1053_v9 }
  0x42   : > { %967 = vmatmul.mubr.f32.vlgmr.msra.gmra.mxu0 %v1130_v39  ;;  %977 = vmatprep.subr.mxu1 %v1055_v10 }
  0x43   : > { %978 = vmatpush3.msra.mxu1 %v1055_v10  ;;  %985 = vmatprep.mubr.f32.mxu1 %v1122_v34 }
  0x44   : > { %979 = vmatprep.subr.mxu1 %v1057_v11 }
  0x45   : > { %980 = vmatpush3.msra.mxu1 %v1057_v11 }
  0x46   : > { %981 = vmatprep.subr.mxu1 %v1078_v17 }
  0x47   : > { %982 = vmatpush3.msra.mxu1 %v1078_v17 }
  0x48   : > { %983 = vmatprep.subr.mxu1 %v1101_v23 }
  0x49   : > { %984 = vmatpush3.msra.mxu1 %v1101_v23 }
  0x4a   : > { %986 = vmatmul.mubr.f32.vlgmr.msra.gmra.mxu1 %v1130_v39 }
  0xdf   : > { %v892_v63 = vpop.f32.mrf.mxu0 }
  0xe1   : > { %v240_v0 = vpop.f32.mrf.mxu0 }
  0xe7   : > { %v911_v1 = vpop.f32.mrf.mxu1 }
  0xe8   : > { %v368_v6 = vadd.f32 %v911_v1, %v892_v63 }
  0xe9   : > { %v361_v3 = vpop.f32.mrf.mxu1 }
  0xea   : > { %v362_v8 = vadd.f32 %v361_v3, %v240_v0 }
  0xf0   : > { %v930_v2 = vpop.f32.mrf.mxu0 }
  0xf1   : > { %v463_v9 = vadd.f32 %v930_v2, %v368_v6 }
  0xf2   : > { %v455_v4 = vpop.f32.mrf.mxu0 }
  0xf3   : > { %v456_v11 = vadd.f32 %v455_v4, %v362_v8 }
  0xf9   : > { %v949_v5 = vpop.f32.mrf.mxu1 }
  0xfa   : > { %v552_v12 = vadd.f32 %v949_v5, %v463_v9 }
  0xfb   : > { %v543_v10 = vpop.f32.mrf.mxu1 }
  0xfc   : > { %v544_v14 = vadd.f32 %v543_v10, %v456_v11 }
 0x102   : > { %v968_v7 = vpop.f32.mrf.mxu0 }
 0x103   : > { %v653_v15 = vadd.f32 %v968_v7, %v552_v12 }
 0x104   : > { %v646_v13 = vpop.f32.mrf.mxu0 }
 0x105   : > { %v647_v17 = vadd.f32 %v646_v13, %v544_v14 }
 0x10a   : > { %v987_v16 = vpop.f32.mrf.mxu1 }
 0x10b   : > { %v738_v18 = vadd.f32 %v987_v16, %v653_v15 }
 0x10c   : > { %v731_v19 = vpop.f32.mrf.mxu1 }
 0x10d   : > { %745 = vst.msk [vmem:[%s143_s6 + $0x10] sm:$0xff] %vm741_vm1, %v738_v18  ;;  %v732_v20 = vadd.f32 %v731_v19, %v647_v17 }
 0x10f   : > { %744 = vst.msk [vmem:[%s143_s6 + $0x8] sm:$0xff] %vm741_vm1, %v732_v20 }
 0x110 PF: > { %s12_s9 = sadd.s32 1, %s1003_s9  }
 0x111   : > { %p9_p4 = scmp.ge.s32.totalorder %s12_s9, 4  }
 0x113   :  { %11 = sbr.rel (!%p9_p4) target bundleno = 1 (0x1), region = 58 }

// kernel: tpu_custom_call.1
= control target key start
LH: loop header
LB: loop body
LE: loop exit
PB: predicated region body
PF: predicated region fallthrough
CT: control target
= control target key end

     0   :  { %s373_s9 = smov 0   ;;  %s420_s0 = inlined_call_operand.vmem [shape: f32[2,16,64], index: 0, kind: input, shape index: {}]   ;;  %s421_s1 = inlined_call_operand.vmem [shape: f32[64,16], index: 1, kind: input, shape index: {}]   ;;  %s422_s2 = inlined_call_operand.vmem [shape: f32[2,32,16], index: 2, kind: output, shape index: {}]  }
   0x1 LB: > { %s296_s10 = sadd.s32 4294967295, %s355_s9   ;;  %p300_p0 = scmp.ge.s32.totalorder %s355_s9, 1  ;;  %s355_s9 = sphi %s373_s9, %s12_s9  }
   0x2   : > { %p112_p1 = scmp.lt.s32.totalorder %s355_s9, 3 }
   0x4   : > { %p113_p2 = pnand %p300_p0, %p112_p1 }
   0x5   : > { %p134_p3 = scmp.lt.s32.totalorder (!%p113_p2), %s296_s10, 1 }
   0x6   : > { %116 = sbr.rel (%p113_p2) target bundleno = 224 (0xe0), region = 28 }
   0xb   : > { %v153_v0 = vld [vmem:[%s421_s1 + $0x38] sm:$0xff]  ;;  %v152_v1 = vld [vmem:[%s421_s1 + $0x30] sm:$0xff]  ;;  %v151_v2 = vld [vmem:[%s421_s1 + $0x28] sm:$0xff]  ;;  %s424_s10 = smov (!%p134_p3, %s296_s10), 1  ;;  %vm154_vm0 = vcmask 523264   ;;  %vm236_vm1 = vcmask 130048  }
   0xc   : > { %321 = vmatprep.subr.mxu0 %v153_v0  ;;  %v150_v3 = vld [vmem:[%s421_s1 + $0x20] sm:$0xff]  ;;  %s309_s19 = sshll.u32 %s424_s10, 4  ;;  %v149_v4 = vld [vmem:[%s421_s1 + $0x18] sm:$0xff]  ;;  %v148_v6 = vld [vmem:[%s421_s1 + $0x10] sm:$0xff]  ;;  %s310_s3 = sshll.u32 %s424_s10, 5  ;;  %v357_v10 = vmov 0.0  }
   0xd   : > { %322 = vmatpush3.msra.mxu0 %v153_v0  ;;  %s138_s22 = scalar_lea.vmem %s420_s0, %s309_s19  ;;  %v147_v7 = vld [vmem:[%s421_s1 + $0x8] sm:$0xff]  ;;  %v146_v8 = vld [vmem:[%s421_s1] sm:$0xff]  ;;  %s143_s6 = scalar_lea.vmem %s422_s2, %s310_s3 }
   0xe   : > { %323 = vmatprep.subr.mxu0 %v152_v1  ;;  %v144_v5 = vld [vmem:[%s138_s22] sm:$0xff]  ;;  %v145_v9 = vld [vmem:[%s138_s22 + $0x8] sm:$0xff]  ;;  %237 = vst.msk [vmem:[%s143_s6] sm:$0xff] %vm236_vm1, %v357_v10  ;;  %238 = vst.msk [vmem:[%s143_s6 + $0x18] sm:$0xff] %vm236_vm1, %v357_v10 }
   0xf   : > { %324 = vmatpush3.msra.mxu0 %v152_v1  ;;  %337 = vmatprep.mubr.msk.f32.mxu0 %vm154_vm0, %v144_v5 }
  0x10   : > { %325 = vmatprep.subr.mxu0 %v151_v2 }
  0x11   : > { %326 = vmatpush3.msra.mxu0 %v151_v2 }
  0x12   : > { %327 = vmatprep.subr.mxu0 %v150_v3 }
  0x13   : > { %328 = vmatpush3.msra.mxu0 %v150_v3 }
  0x14   : > { %329 = vmatprep.subr.mxu0 %v149_v4 }
  0x15   : > { %330 = vmatpush3.msra.mxu0 %v149_v4 }
  0x16   : > { %331 = vmatprep.subr.mxu0 %v148_v6 }
  0x17   : > { %332 = vmatpush3.msra.mxu0 %v148_v6 }
  0x18   : > { %333 = vmatprep.subr.mxu0 %v147_v7 }
  0x19   : > { %334 = vmatpush3.msra.mxu0 %v147_v7 }
  0x1a   : > { %335 = vmatprep.subr.mxu0 %v146_v8 }
  0x1b   : > { %336 = vmatpush3.msra.mxu0 %v146_v8 }
  0x1c   : > { %338 = vmatmul.mubr.msk.f32.vlgmr.msra.gmra.mxu0 %vm154_vm0, %v145_v9 }
  0xdc   : > { %v339_v11 = vpop.f32.mrf.mxu0 }
  0xdd   : > { %240 = vst.msk [vmem:[%s143_s6 + $0x10] sm:$0xff] %vm236_vm1, %v339_v11 }
  0xde   : > { %v227_v12 = vpop.f32.mrf.mxu0 }
  0xdf   : > { %239 = vst.msk [vmem:[%s143_s6 + $0x8] sm:$0xff] %vm236_vm1, %v227_v12 }
  0xe0 PF: > { %s12_s9 = sadd.s32 1, %s355_s9  }
  0xe1   : > { %p9_p4 = scmp.ge.s32.totalorder %s12_s9, 4  }
  0xe3   :  { %11 = sbr.rel (!%p9_p4) target bundleno = 1 (0x1), region = 58 }

</bundles_post_ra>
